<compile_context>
chip_gen: v7x
topology: tpu7x:2x2x1
jax: 0.10.0
libtpu: 0.0.40
codegen_flags: <defaults>
</compile_context>

<pallas_src>
import math

import jax
import jax.numpy as jnp
from jax.experimental import pallas as pl
from jax.experimental.pallas import tpu as pltpu


def _dice_partials_kernel(p_ref, t_ref, inter_ref, card_ref):
    """Accumulate per-class (C, 128) lane partials of intersection/cardinality.

    p_ref:     [C, tn_s, 128]  probability block (native dtype)
    t_ref:     [1, tn_s, 128]  int32 label block (-1 == padding, matches no class)
    inter_ref: [C, 128] f32    grid-persistent output accumulator
    card_ref:  [C, 128] f32    grid-persistent output accumulator
    """
    first = (pl.program_id(0) == 0) & (pl.program_id(1) == 0)

    @pl.when(first)
    def _():
        inter_ref[...] = jnp.zeros_like(inter_ref)
        card_ref[...] = jnp.zeros_like(card_ref)

    t = t_ref[0]                                       # [tn_s, 128] int32
    C = p_ref.shape[0]
    inter_rows = []
    card_rows = []
    for c in range(C):                                 # C is small & static: unrolled
        pc = p_ref[c].astype(jnp.float32)              # [tn_s, 128]
        hot = (t == c).astype(jnp.float32)             # [tn_s, 128] one-hot slice
        # intersection_c = sum(p_c * one_hot_c); cardinality_c = sum(p_c + one_hot_c)
        inter_rows.append(jnp.sum(pc * hot, axis=0, keepdims=True))   # [1, 128]
        card_rows.append(jnp.sum(pc + hot, axis=0, keepdims=True))    # [1, 128]

    # Single full-block accumulate per output (avoids C masked 1-sublane stores).
    inter_ref[...] += jnp.concatenate(inter_rows, axis=0)             # [C, 128]
    card_ref[...] += jnp.concatenate(card_rows, axis=0)               # [C, 128]


def dice_loss(inputs, targets, smooth=1e-8, *, tile_rows=1024):
    """inputs: [B, C, *spatial] float, targets: [B(,1), *spatial] int."""
    if targets.ndim == inputs.ndim and targets.shape[1] == 1:
        targets = jnp.squeeze(targets, axis=1)

    B, C = inputs.shape[0], inputs.shape[1]
    S = math.prod(inputs.shape[2:])
    # TODO(synk): torch derives num_classes = int(targets.max() + 1) on the host
    # (device sync); that only works when it equals C, so we use the static C.
    # The probas.size(1) == 1 (re-one-hot integer inputs) branch is not implemented.

    rows = pl.cdiv(S, 128)
    if rows <= tile_rows:
        tn_s = rows                      # single block along rows: full extent is OK
        rows_pad = rows
    else:
        assert tile_rows % 8 == 0, "tile_rows must be a multiple of 8"
        tn_s = tile_rows
        rows_pad = pl.cdiv(rows, tn_s) * tn_s
    S_pad = rows_pad * 128

    p = inputs.reshape(B * C, S)                       # contiguous reshape, no copy
    t = targets.reshape(B, S).astype(jnp.int32)
    if S_pad != S:
        p = jnp.pad(p, ((0, 0), (0, S_pad - S)))                       # 0 -> adds 0
        t = jnp.pad(t, ((0, 0), (0, S_pad - S)), constant_values=-1)   # -1 -> no class
    p = p.reshape(B * C, rows_pad, 128)
    t = t.reshape(B, rows_pad, 128)

    grid = (B, rows_pad // tn_s)
    inter, card = pl.pallas_call(
        _dice_partials_kernel,
        out_shape=(jax.ShapeDtypeStruct((C, 128), jnp.float32),
                   jax.ShapeDtypeStruct((C, 128), jnp.float32)),
        grid_spec=pltpu.PrefetchScalarGridSpec(
            num_scalar_prefetch=0,
            grid=grid,
            in_specs=[
                pl.BlockSpec((C, tn_s, 128), lambda b, n: (b, n, 0)),
                pl.BlockSpec((1, tn_s, 128), lambda b, n: (b, n, 0)),
            ],
            out_specs=(
                pl.BlockSpec((C, 128), lambda b, n: (0, 0)),
                pl.BlockSpec((C, 128), lambda b, n: (0, 0)),
            ),
        ),
        compiler_params=pltpu.CompilerParams(
            # both grid axes feed the same grid-persistent accumulator blocks
            dimension_semantics=("arbitrary", "arbitrary")),
    )(p, t)

    # Tiny epilogue in plain JAX: lane reduction + smooth + mean over classes.
    inter = jnp.sum(inter, axis=1)                     # [C]
    card = jnp.sum(card, axis=1)                       # [C]
    dice = jnp.mean((2.0 * inter + smooth) / (card + smooth))
    return (1.0 - dice).astype(jnp.float32)


def dice_loss_reference(inputs, targets, smooth=1e-8):
    """Pure-JAX reference matching the torch forward (5-D volumetric inputs)."""
    C = inputs.shape[1]
    one_hot = jax.nn.one_hot(targets, C, dtype=jnp.float32)           # [B,D,H,W,C]
    one_hot = jnp.transpose(one_hot, (0, 4, 1, 2, 3))                 # [B,C,D,H,W]
    probas = inputs.astype(jnp.float32)
    dims = (0, 2, 3, 4)
    intersection = jnp.sum(probas * one_hot, axis=dims)
    cardinality = jnp.sum(probas + one_hot, axis=dims)
    dice = jnp.mean((2.0 * intersection + smooth) / (cardinality + smooth))
    return 1.0 - dice


if __name__ == "__main__":
    key = jax.random.PRNGKey(0)
    k_in, k_tg = jax.random.split(key)

    B, C, D, H, W = 2, 4, 4, 16, 16
    inputs = jax.random.uniform(k_in, (B, C, D, H, W), dtype=jnp.float32)
    targets = jax.random.randint(k_tg, (B, D, H, W), 0, C, dtype=jnp.int32)
    # make sure every class id appears so torch's num_classes == C deterministically
    targets = targets.at[0, 0, 0, :C].set(jnp.arange(C, dtype=jnp.int32))

    loss_fn = jax.jit(dice_loss)          # no host syncs: fully jittable
    loss = jax.block_until_ready(loss_fn(inputs, targets))

    ref = jax.block_until_ready(dice_loss_reference(inputs, targets))
    assert abs(float(loss) - float(ref)) < 1e-5, (float(loss), float(ref))

    print("KERNEL_OK")
</pallas_src>

<mosaic_0001>
module attributes {stable_mosaic.version = 11 : i64} {
  func.func @_dice_partials_kernel(%arg0: i32, %arg1: i32, %arg2: memref<4x8x128xf32, #tpu.memory_space<vmem>>, %arg3: memref<1x8x128xi32, #tpu.memory_space<vmem>>, %arg4: memref<4x128xf32, #tpu.memory_space<vmem>>, %arg5: memref<4x128xf32, #tpu.memory_space<vmem>>) attributes {dimension_semantics = [#tpu.dimension_semantics<arbitrary>, #tpu.dimension_semantics<arbitrary>], iteration_bounds = array<i64: 2, 1>, scalar_prefetch = 0 : i64, scratch_operands = 0 : i64, tpu.core_type = #tpu.core_type<tc>, window_params = [{transform_indices = @transform_0, window_bounds = array<i64: 4, 8, 128>}, {transform_indices = @transform_1, window_bounds = array<i64: 1, 8, 128>}, {pipeline_mode = #tpu.pipeline_mode<synchronous>, transform_indices = @transform_2, window_bounds = array<i64: 4, 128>}, {pipeline_mode = #tpu.pipeline_mode<synchronous>, transform_indices = @transform_3, window_bounds = array<i64: 4, 128>}]} {
    %c0_i32 = arith.constant 0 : i32
    %0 = arith.cmpi eq, %arg0, %c0_i32 : i32
    %c0_i32_0 = arith.constant 0 : i32
    %1 = arith.cmpi eq, %arg1, %c0_i32_0 : i32
    %2 = arith.andi %0, %1 : i1
    %3 = arith.extui %2 : i1 to i32
    %c0_i32_1 = arith.constant 0 : i32
    %4 = arith.cmpi ne, %3, %c0_i32_1 : i32
    scf.if %4 {
      %cst_29 = arith.constant 0.000000e+00 : f32
      %63 = vector.broadcast %cst_29 : f32 to vector<4x128xf32>
      %c0_30 = arith.constant 0 : index
      %c0_31 = arith.constant 0 : index
      %64 = vector.load %arg4[%c0_30, %c0_31] : memref<4x128xf32, #tpu.memory_space<vmem>>, vector<4x128xf32>
      tpu.vector_store %arg4[%c0_30, %c0_31], %63 {strides = array<i32>} : memref<4x128xf32, #tpu.memory_space<vmem>>, vector<4x128xf32>,
      %cst_32 = arith.constant 0.000000e+00 : f32
      %65 = vector.broadcast %cst_32 : f32 to vector<4x128xf32>
      %c0_33 = arith.constant 0 : index
      %c0_34 = arith.constant 0 : index
      %66 = vector.load %arg5[%c0_33, %c0_34] : memref<4x128xf32, #tpu.memory_space<vmem>>, vector<4x128xf32>
      tpu.vector_store %arg5[%c0_33, %c0_34], %65 {strides = array<i32>} : memref<4x128xf32, #tpu.memory_space<vmem>>, vector<4x128xf32>,
    } else {
    }
    %c0 = arith.constant 0 : index
    %c0_2 = arith.constant 0 : index
    %c0_3 = arith.constant 0 : index
    %5 = vector.load %arg3[%c0, %c0_2, %c0_3] : memref<1x8x128xi32, #tpu.memory_space<vmem>>, vector<1x8x128xi32>
    %6 = vector.shape_cast %5 : vector<1x8x128xi32> to vector<8x128xi32>
    %c0_4 = arith.constant 0 : index
    %c0_5 = arith.constant 0 : index
    %c0_6 = arith.constant 0 : index
    %7 = vector.load %arg2[%c0_4, %c0_5, %c0_6] : memref<4x8x128xf32, #tpu.memory_space<vmem>>, vector<1x8x128xf32>
    %8 = vector.shape_cast %7 : vector<1x8x128xf32> to vector<8x128xf32>
    %c0_i32_7 = arith.constant 0 : i32
    %9 = vector.broadcast %c0_i32_7 : i32 to vector<8x128xi32>
    %10 = arith.cmpi eq, %6, %9 : vector<8x128xi32>
    %11 = arith.extui %10 : vector<8x128xi1> to vector<8x128xi32>
    %12 = arith.sitofp %11 : vector<8x128xi32> to vector<8x128xf32>
    %13 = arith.mulf %8, %12 : vector<8x128xf32>
    %cst = arith.constant dense<0.000000e+00> : vector<128xf32>
    %14 = vector.multi_reduction <add>, %13, %cst [0] : vector<8x128xf32> to vector<128xf32>
    %15 = vector.shape_cast %14 : vector<128xf32> to vector<1x128xf32>
    %16 = arith.addf %8, %12 : vector<8x128xf32>
    %cst_8 = arith.constant dense<0.000000e+00> : vector<128xf32>
    %17 = vector.multi_reduction <add>, %16, %cst_8 [0] : vector<8x128xf32> to vector<128xf32>
    %18 = vector.shape_cast %17 : vector<128xf32> to vector<1x128xf32>
    %c1 = arith.constant 1 : index
    %c0_9 = arith.constant 0 : index
    %c0_10 = arith.constant 0 : index
    %19 = vector.load %arg2[%c1, %c0_9, %c0_10] : memref<4x8x128xf32, #tpu.memory_space<vmem>>, vector<1x8x128xf32>
    %20 = vector.shape_cast %19 : vector<1x8x128xf32> to vector<8x128xf32>
    %c1_i32 = arith.constant 1 : i32
    %21 = vector.broadcast %c1_i32 : i32 to vector<8x128xi32>
    %22 = arith.cmpi eq, %6, %21 : vector<8x128xi32>
    %23 = arith.extui %22 : vector<8x128xi1> to vector<8x128xi32>
    %24 = arith.sitofp %23 : vector<8x128xi32> to vector<8x128xf32>
    %25 = arith.mulf %20, %24 : vector<8x128xf32>
    %cst_11 = arith.constant dense<0.000000e+00> : vector<128xf32>
    %26 = vector.multi_reduction <add>, %25, %cst_11 [0] : vector<8x128xf32> to vector<128xf32>
    %27 = vector.shape_cast %26 : vector<128xf32> to vector<1x128xf32>
    %28 = arith.addf %20, %24 : vector<8x128xf32>
    %cst_12 = arith.constant dense<0.000000e+00> : vector<128xf32>
    %29 = vector.multi_reduction <add>, %28, %cst_12 [0] : vector<8x128xf32> to vector<128xf32>
    %30 = vector.shape_cast %29 : vector<128xf32> to vector<1x128xf32>
    %c2 = arith.constant 2 : index
    %c0_13 = arith.constant 0 : index
    %c0_14 = arith.constant 0 : index
    %31 = vector.load %arg2[%c2, %c0_13, %c0_14] : memref<4x8x128xf32, #tpu.memory_space<vmem>>, vector<1x8x128xf32>
    %32 = vector.shape_cast %31 : vector<1x8x128xf32> to vector<8x128xf32>
    %c2_i32 = arith.constant 2 : i32
    %33 = vector.broadcast %c2_i32 : i32 to vector<8x128xi32>
    %34 = arith.cmpi eq, %6, %33 : vector<8x128xi32>
    %35 = arith.extui %34 : vector<8x128xi1> to vector<8x128xi32>
    %36 = arith.sitofp %35 : vector<8x128xi32> to vector<8x128xf32>
    %37 = arith.mulf %32, %36 : vector<8x128xf32>
    %cst_15 = arith.constant dense<0.000000e+00> : vector<128xf32>
    %38 = vector.multi_reduction <add>, %37, %cst_15 [0] : vector<8x128xf32> to vector<128xf32>
    %39 = vector.shape_cast %38 : vector<128xf32> to vector<1x128xf32>
    %40 = arith.addf %32, %36 : vector<8x128xf32>
    %cst_16 = arith.constant dense<0.000000e+00> : vector<128xf32>
    %41 = vector.multi_reduction <add>, %40, %cst_16 [0] : vector<8x128xf32> to vector<128xf32>
    %42 = vector.shape_cast %41 : vector<128xf32> to vector<1x128xf32>
    %c3 = arith.constant 3 : index
    %c0_17 = arith.constant 0 : index
    %c0_18 = arith.constant 0 : index
    %43 = vector.load %arg2[%c3, %c0_17, %c0_18] : memref<4x8x128xf32, #tpu.memory_space<vmem>>, vector<1x8x128xf32>
    %44 = vector.shape_cast %43 : vector<1x8x128xf32> to vector<8x128xf32>
    %c3_i32 = arith.constant 3 : i32
    %45 = vector.broadcast %c3_i32 : i32 to vector<8x128xi32>
    %46 = arith.cmpi eq, %6, %45 : vector<8x128xi32>
    %47 = arith.extui %46 : vector<8x128xi1> to vector<8x128xi32>
    %48 = arith.sitofp %47 : vector<8x128xi32> to vector<8x128xf32>
    %49 = arith.mulf %44, %48 : vector<8x128xf32>
    %cst_19 = arith.constant dense<0.000000e+00> : vector<128xf32>
    %50 = vector.multi_reduction <add>, %49, %cst_19 [0] : vector<8x128xf32> to vector<128xf32>
    %51 = vector.shape_cast %50 : vector<128xf32> to vector<1x128xf32>
    %52 = arith.addf %44, %48 : vector<8x128xf32>
    %cst_20 = arith.constant dense<0.000000e+00> : vector<128xf32>
    %53 = vector.multi_reduction <add>, %52, %cst_20 [0] : vector<8x128xf32> to vector<128xf32>
    %54 = vector.shape_cast %53 : vector<128xf32> to vector<1x128xf32>
    %c0_21 = arith.constant 0 : index
    %c0_22 = arith.constant 0 : index
    %55 = vector.load %arg4[%c0_21, %c0_22] : memref<4x128xf32, #tpu.memory_space<vmem>>, vector<4x128xf32>
    %56 = tpu.concatenate %15, %27, %39, %51 in 0 : vector<1x128xf32>, vector<1x128xf32>, vector<1x128xf32>, vector<1x128xf32> -> vector<4x128xf32>
    %57 = arith.addf %55, %56 : vector<4x128xf32>
    %c0_23 = arith.constant 0 : index
    %c0_24 = arith.constant 0 : index
    %58 = vector.load %arg4[%c0_23, %c0_24] : memref<4x128xf32, #tpu.memory_space<vmem>>, vector<4x128xf32>
    tpu.vector_store %arg4[%c0_23, %c0_24], %57 {strides = array<i32>} : memref<4x128xf32, #tpu.memory_space<vmem>>, vector<4x128xf32>,
    %c0_25 = arith.constant 0 : index
    %c0_26 = arith.constant 0 : index
    %59 = vector.load %arg5[%c0_25, %c0_26] : memref<4x128xf32, #tpu.memory_space<vmem>>, vector<4x128xf32>
    %60 = tpu.concatenate %18, %30, %42, %54 in 0 : vector<1x128xf32>, vector<1x128xf32>, vector<1x128xf32>, vector<1x128xf32> -> vector<4x128xf32>
    %61 = arith.addf %59, %60 : vector<4x128xf32>
    %c0_27 = arith.constant 0 : index
    %c0_28 = arith.constant 0 : index
    %62 = vector.load %arg5[%c0_27, %c0_28] : memref<4x128xf32, #tpu.memory_space<vmem>>, vector<4x128xf32>
    tpu.vector_store %arg5[%c0_27, %c0_28], %61 {strides = array<i32>} : memref<4x128xf32, #tpu.memory_space<vmem>>, vector<4x128xf32>,
    return
  }
  func.func @transform_0(%arg0: i32, %arg1: i32) -> (i32, i32, i32) {
    %c0_i32 = arith.constant 0 : i32
    %c0_i32_0 = arith.constant 0 : i32
    return %arg0, %arg1, %c0_i32 : i32, i32, i32
  }
  func.func @transform_1(%arg0: i32, %arg1: i32) -> (i32, i32, i32) {
    %c0_i32 = arith.constant 0 : i32
    %c0_i32_0 = arith.constant 0 : i32
    return %arg0, %arg1, %c0_i32 : i32, i32, i32
  }
  func.func @transform_2(%arg0: i32, %arg1: i32) -> (i32, i32) {
    %c0_i32 = arith.constant 0 : i32
    %c0_i32_0 = arith.constant 0 : i32
    %c0_i32_1 = arith.constant 0 : i32
    return %c0_i32, %c0_i32_0 : i32, i32
  }
  func.func @transform_3(%arg0: i32, %arg1: i32) -> (i32, i32) {
    %c0_i32 = arith.constant 0 : i32
    %c0_i32_0 = arith.constant 0 : i32
    %c0_i32_1 = arith.constant 0 : i32
    return %c0_i32, %c0_i32_0 : i32, i32
  }
}

</mosaic_0001>

<bundles_post_ra>
// kernel: dice_loss.1
= control target key start
LH: loop header
LB: loop body
LE: loop exit
PB: predicated region body
PF: predicated region fallthrough
CT: control target
= control target key end

     0   :  { %s456_s12 = smov 0   ;;  %s458_s13 = smov 0   ;;  %s513_s0 = inlined_call_operand.vmem [shape: f32[8,8,128], index: 0, kind: input, shape index: {}]   ;;  %s514_s1 = inlined_call_operand.vmem [shape: s32[2,8,128], index: 1, kind: input, shape index: {}]   ;;  %s515_s2 = inlined_call_operand.vmem [shape: f32[4,128], index: 2, kind: output, shape index: {0}]   ;;  %s516_s3 = inlined_call_operand.vmem [shape: f32[4,128], index: 3, kind: output, shape index: {1}]  }
   0x1   :  { %s460_s14 = smov 0  }
   0x2 LB: > { %s26_s15 = sadd.s32 1, %s428_s13  ;;  %p369_p0 = scmp.ge.s32.totalorder %s432_s14, 1  ;;  %s432_s14 = sphi %s460_s14, %s14_s14   ;;  %s428_s13 = sphi %s458_s13, %s518_s13   ;;  %s424_s12 = sphi %s456_s12, %s517_s12  }
   0x3   : > { %p28_p1 = scmp.ge.s32.totalorder %s26_s15, 2  ;;  %p162_p2 = scmp.lt.s32.totalorder %s432_s14, 3 }
   0x5   : > { %s520_s15 = smov (%p28_p1, %s26_s15), 0  ;;  %p163_p3 = pnand %p369_p0, %p162_p2 }
   0x6   : > { %s370_s16 = sshll.u32 (!%p163_p3), %s424_s12, 2  ;;  %p200_p4 = scmp.lt.s32.totalorder (!%p163_p3), %s424_s12, 1 }
   0x7   : > { %166 = sbr.rel (%p163_p3) target bundleno = 48 (0x30), region = 28  ;;  %p192_p5 = scmp.lt.s32.totalorder (!%p163_p3), %s370_s16, 7 }
   0x8   : > { %p207_p6 = scmp.eq.s32.totalorder (!%p163_p3), %s424_s12, 0 }
   0xe   : > { %s522_s12 = smov (!%p200_p4, %s424_s12), 1  ;;  %s524_s16 = smov (!%p192_p5, %s370_s16), 7 }
   0xf   : > { %s372_s17 = sshll.u32 %s522_s12, 3  ;;  %s371_s18 = sshll.u32 %s524_s16, 3  ;;  %v434_v0 = vmov (%p207_p6), 0.0  }
  0x10   : > { %s206_s21 = scalar_lea.vmem %s514_s1, %s372_s17  ;;  %s198_s24 = scalar_lea.vmem %s513_s0, %s371_s18  ;;  %213 = vst [vmem:[%s515_s2] sm:$0xf] (%p207_p6), %v434_v0  ;;  %214 = vst [vmem:[%s516_s3] sm:$0xf] (%p207_p6), %v434_v0 }
  0x11   : > { %212 = sbr.rel (!%p207_p6) target bundleno = 24 (0x18), region = 32 }
  0x18 PF: > { %v215_v1 = vld [vmem:[%s206_s21] sm:$0xff]  ;;  %v375_v3 = vld [vmem:[%s198_s24 + $0x8] sm:$0xff]  ;;  %v377_v4 = vld [vmem:[%s198_s24 + $0x10] sm:$0xff]  ;;  %v435_v6 = vmov 0.0   ;;  %vm292_vm4 = vcmask 1040384   ;;  %vm294_vm5 = vcmask 1041408  }
  0x19   : > { %v216_v2 = vld [vmem:[%s198_s24] sm:$0xff]  ;;  %vm217_vm0 = vcmp.eq.s32.totalorder %v215_v1, 0  ;;  %vm236_vm1 = vcmp.eq.s32.totalorder %v215_v1, 1  ;;  %vm255_vm2 = vcmp.eq.s32.totalorder %v215_v1, 2  ;;  %v379_v5 = vld [vmem:[%s198_s24 + $0x18] sm:$0xff]  ;;  %vm274_vm3 = vcmp.eq.s32.totalorder %v215_v1, 3 }
  0x1a   : > { %v374_v7 = vsel %vm217_vm0, 1.0, %v435_v6  ;;  %v376_v8 = vsel %vm236_vm1, 1.0, %v435_v6  ;;  %v378_v9 = vsel %vm255_vm2, 1.0, %v435_v6  ;;  %v380_v10 = vsel %vm274_vm3, 1.0, %v435_v6  ;;  %v300_v6 = vld [vmem:[%s516_s3] sm:$0xf] }
  0x1b   : > { %v220_v11 = vmul.f32 %v374_v7, %v216_v2  ;;  %v239_v12 = vmul.f32 %v376_v8, %v375_v3  ;;  %v258_v13 = vmul.f32 %v378_v9, %v377_v4  ;;  %v277_v14 = vmul.f32 %v380_v10, %v379_v5 }
  0x1c   : > { %v227_v15 = vadd.f32 %v374_v7, %v216_v2  ;;  %v246_v16 = vadd.f32 %v376_v8, %v375_v3  ;;  %v265_v17 = vadd.f32 %v378_v9, %v377_v4  ;;  %v284_v25 = vadd.f32 %v380_v10, %v379_v5  ;;  %v291_v2 = vld [vmem:[%s515_s2] sm:$0xf] }
  0x1d   : > { %v221_v18 = vrot.slane %v220_v11, 4  ;;  %v240_v19 = vrot.slane %v239_v12, 4  ;;  %v259_v20 = vrot.slane %v258_v13, 4  ;;  %v278_v21 = vrot.slane %v277_v14, 4 }
  0x1e   : > { %v228_v22 = vrot.slane %v227_v15, 4  ;;  %v247_v23 = vrot.slane %v246_v16, 4  ;;  %v266_v24 = vrot.slane %v265_v17, 4  ;;  %vm296_vm6 = vcmask 1042432  }
  0x1f   : > { %v222_v26 = vadd.f32 %v221_v18, %v220_v11  ;;  %v241_v27 = vadd.f32 %v240_v19, %v239_v12  ;;  %v260_v28 = vadd.f32 %v259_v20, %v258_v13  ;;  %v279_v29 = vadd.f32 %v278_v21, %v277_v14 }
  0x20   : > { %v229_v30 = vadd.f32 %v228_v22, %v227_v15  ;;  %v248_v31 = vadd.f32 %v247_v23, %v246_v16  ;;  %v267_v32 = vadd.f32 %v266_v24, %v265_v17  ;;  %v285_v33 = vrot.slane %v284_v25, 4 }
  0x21   : > { %v223_v34 = vrot.slane %v222_v26, 2  ;;  %v242_v35 = vrot.slane %v241_v27, 2  ;;  %v261_v36 = vrot.slane %v260_v28, 2  ;;  %v280_v37 = vrot.slane %v279_v29, 2 }
  0x22   : > { %v230_v38 = vrot.slane %v229_v30, 2  ;;  %v249_v39 = vrot.slane %v248_v31, 2  ;;  %v268_v40 = vrot.slane %v267_v32, 2  ;;  %v286_v41 = vadd.f32 %v285_v33, %v284_v25 }
  0x23   : > { %v224_v42 = vadd.f32 %v223_v34, %v222_v26  ;;  %v243_v43 = vadd.f32 %v242_v35, %v241_v27  ;;  %v262_v44 = vadd.f32 %v261_v36, %v260_v28  ;;  %v281_v45 = vadd.f32 %v280_v37, %v279_v29 }
  0x24   : > { %v231_v46 = vadd.f32 %v230_v38, %v229_v30  ;;  %v250_v47 = vadd.f32 %v249_v39, %v248_v31  ;;  %v269_v48 = vadd.f32 %v268_v40, %v267_v32  ;;  %v287_v49 = vrot.slane %v286_v41, 2 }
  0x25   : > { %v225_v50 = vrot.slane %v224_v42, 1  ;;  %v244_v51 = vrot.slane %v243_v43, 1  ;;  %v263_v52 = vrot.slane %v262_v44, 1  ;;  %v282_v53 = vrot.slane %v281_v45, 1 }
  0x26   : > { %v232_v54 = vrot.slane %v231_v46, 1  ;;  %v251_v55 = vrot.slane %v250_v47, 1  ;;  %v270_v56 = vrot.slane %v269_v48, 1  ;;  %v288_v57 = vadd.f32 %v287_v49, %v286_v41 }
  0x27   : > { %v226_v58 = vadd.f32 %v225_v50, %v224_v42  ;;  %v245_v59 = vadd.f32 %v244_v51, %v243_v43  ;;  %v264_v60 = vadd.f32 %v263_v52, %v262_v44  ;;  %v283_v61 = vadd.f32 %v282_v53, %v281_v45 }
  0x28   : > { %v233_v62 = vadd.f32 %v232_v54, %v231_v46  ;;  %v252_v63 = vadd.f32 %v251_v55, %v250_v47  ;;  %v271_v0 = vadd.f32 %v270_v56, %v269_v48  ;;  %v289_v1 = vrot.slane %v288_v57, 1 }
  0x29   : > { %v293_v3 = vsel %vm292_vm4, %v226_v58, %v245_v59 }
  0x2a   : > { %v295_v4 = vsel %vm294_vm5, %v293_v3, %v264_v60  ;;  %v290_v5 = vadd.f32 %v289_v1, %v288_v57  ;;  %v301_v7 = vsel %vm292_vm4, %v233_v62, %v252_v63 }
  0x2b   : > { %v297_v8 = vsel %vm296_vm6, %v295_v4, %v283_v61  ;;  %v302_v9 = vsel %vm294_vm5, %v301_v7, %v271_v0 }
  0x2c   : > { %v298_v10 = vadd.f32 %v297_v8, %v291_v2  ;;  %v303_v11 = vsel %vm296_vm6, %v302_v9, %v290_v5 }
  0x2d   : > { %v304_v12 = vadd.f32 %v303_v11, %v300_v6 }
  0x2e   : > { %299 = vst [vmem:[%s515_s2] sm:$0xf] %v298_v10 }
  0x2f   : > { %305 = vst [vmem:[%s516_s3] sm:$0xf] %v304_v12 }
  0x30 PF: > { %s14_s14 = sadd.s32 1, %s432_s14   ;;  %s517_s12 = smov %s428_s13 }
  0x31   : > { %p11_p7 = scmp.ge.s32.totalorder %s14_s14, 4   ;;  %s518_s13 = smov %s520_s15 }
  0x33   :  { %13 = sbr.rel (!%p11_p7) target bundleno = 2 (0x2), region = 72 }

</bundles_post_ra>
